<compile_context>
chip_gen: v7x
topology: tpu7x:2x2x1
jax: 0.10.0
libtpu: 0.0.40
codegen_flags: <defaults>
</compile_context>

<pallas_src>
import functools

import jax
import jax.numpy as jnp
from jax import lax
from jax.experimental import pallas as pl
from jax.experimental.pallas import tpu as pltpu


def _tree_sum(terms):
    """Balanced pairwise sum: independent adds expose ILP across VALU slots."""
    terms = list(terms)
    while len(terms) > 1:
        nxt = [terms[i] + terms[i + 1] for i in range(0, len(terms) - 1, 2)]
        if len(terms) % 2:
            nxt.append(terms[-1])
        terms = nxt
    return terms[0]


def convdp_kernel(x_ref, p_ref, m_ref, o_ref, *, Cin, W, apply_relu):
    """Fused 1x1 conv -> 3x3 depthwise conv -> per-channel scale/shift (+ReLU).

    x_ref: (Nb, Cin,  P)    Nb images; channels on sublanes, P=H*W on lanes
    p_ref: (Cout, Cin+12)   packed params: [w1 | b1 | w2 (9 taps) | scale | shift]
    m_ref: (4, Cout, P)     f32 boundary masks: [w>0, w<W-1, h>0, h<H-1]
    o_ref: (Nb, Cout, P)
    """
    P = x_ref.shape[-1]
    Cout = o_ref.shape[1]

    x = x_ref[...]                               # (Nb, Cin, P), lane-dense
    p = p_ref[...]                               # (Cout, Cin+12), read once
    w1 = p[:, :Cin]                              # (Cout, Cin)
    b1 = p[:, Cin:Cin + 1]                       # (Cout, 1)
    w2 = p[:, Cin + 1:Cin + 10]                  # (Cout, 9) depthwise taps
    scale = p[:, Cin + 10:Cin + 11]              # (Cout, 1) folded BN scale
    shift = p[:, Cin + 11:Cin + 12]              # (Cout, 1) folded BN shift + bias

    mask_col_l = m_ref[0]                        # 0.0 where w == 0   (dx = -1)
    mask_col_r = m_ref[1]                        # 0.0 where w == W-1 (dx = +1)
    mask_row_u = m_ref[2]                        # 0.0 where h == 0   (dy = -1)
    mask_row_d = m_ref[3]                        # 0.0 where h == H-1 (dy = +1)

    # ---- 1x1 pointwise conv: Cin broadcast-FMAs on the VPU (tree-summed) ---
    y1 = _tree_sum([w1[:, ci:ci + 1] * x[:, ci:ci + 1, :] for ci in range(Cin)])
    y1 = y1 + b1                                 # (Nb, Cout, P)

    # ---- 3x3 depthwise conv: shared dx-shifted operands, then dy row shifts -
    # y_l[p] = y1[p-1] (left neighbour), y_r[p] = y1[p+1] (right neighbour)
    y_l = mask_col_l * pltpu.roll(y1, shift=1 % P, axis=2)
    y_r = mask_col_r * pltpu.roll(y1, shift=(P - 1) % P, axis=2)

    # per-row weighted sums: three independent FMA chains (kh = 0,1,2 <-> dy=-1,0,+1)
    rows = [
        _tree_sum([w2[:, 3 * r + 0:3 * r + 1] * y_l,
                   w2[:, 3 * r + 1:3 * r + 2] * y1,
                   w2[:, 3 * r + 2:3 * r + 3] * y_r])
        for r in range(3)
    ]

    acc = _tree_sum([
        mask_row_u * pltpu.roll(rows[0], shift=W % P, axis=2),        # dy = -1
        rows[1],                                                      # dy =  0
        mask_row_d * pltpu.roll(rows[2], shift=(P - W) % P, axis=2),  # dy = +1
    ])

    # ---- folded conv2-bias + eval-mode BatchNorm, then ReLU -----------------
    out = acc * scale + shift
    if apply_relu:
        out = jnp.maximum(out, 0.0)
    o_ref[...] = out.astype(o_ref.dtype)


def _pick_image_block(N, Cin, Cout, P):
    """Images per grid step: fill a VMEM budget, keep >= 2 parallel grid steps."""
    # double-buffered in+out blocks plus ~6 live (Nb, Cout, P) f32 temporaries
    bytes_per_image = (2 * (Cin + Cout) + 6 * Cout) * P * 4
    vmem_budget = 8 * 1024 * 1024          # conservative (v7x: 64 MiB VMEM / TC)
    nb = max(1, min(N, vmem_budget // max(1, bytes_per_image)))
    if N >= 2:
        nb = min(nb, (N + 1) // 2)         # >= 2 grid steps keep both v7x TCs busy
    while N % nb:                          # full blocks only (no padded tail)
        nb -= 1
    return nb


def conv_dp_unit(x_nchw, params, with_bn_relu=True):
    """Forward pass of ConvDPUnit.  x_nchw: (N, Cin, H, W) float32 (NCHW)."""
    N, Cin, H, W = x_nchw.shape
    Cout = params["conv1_w"].shape[0]
    P = H * W
    eps = 1e-5

    # ---- parameter folding into one (Cout, Cin+12) slab (plain-JAX glue) ----
    w1 = params["conv1_w"][:, :, 0, 0]
    b1 = params["conv1_b"].reshape(Cout, 1)
    w2 = params["conv2_w"].reshape(Cout, 9)
    if with_bn_relu:
        inv = params["bn_gamma"] / jnp.sqrt(params["bn_var"] + eps)
        scale = inv
        shift = (params["conv2_b"] - params["bn_mean"]) * inv + params["bn_beta"]
    else:
        scale = jnp.ones((Cout,), jnp.float32)
        shift = params["conv2_b"]
    p_slab = jnp.concatenate(
        [w1, b1, w2, scale.reshape(Cout, 1), shift.reshape(Cout, 1)],
        axis=1).astype(jnp.float32)                       # (Cout, Cin + 12)

    # ---- precomputed f32 boundary masks (hoisted out of the kernel) --------
    p_idx = jnp.arange(P, dtype=jnp.int32)
    w_idx = p_idx % W
    masks = jnp.stack([w_idx >= 1,          # dx = -1 source column valid
                       w_idx <= W - 2,      # dx = +1 source column valid
                       p_idx >= W,          # dy = -1 source row valid
                       p_idx < P - W])      # dy = +1 source row valid
    masks = jnp.broadcast_to(masks.astype(jnp.float32)[:, None, :],
                             (4, Cout, P))

    # Free reshape (merges trailing dims) -- no NCHW<->NHWC transpose passes.
    x = x_nchw.astype(jnp.float32).reshape(N, Cin, P)

    nb = _pick_image_block(N, Cin, Cout, P)
    kernel = functools.partial(convdp_kernel, Cin=Cin, W=W,
                               apply_relu=with_bn_relu)
    out = pl.pallas_call(
        kernel,
        out_shape=jax.ShapeDtypeStruct((N, Cout, P), jnp.float32),
        grid_spec=pltpu.PrefetchScalarGridSpec(
            num_scalar_prefetch=0,
            grid=(N // nb,),
            in_specs=[
                pl.BlockSpec((nb, Cin, P), lambda n: (n, 0, 0)),
                pl.BlockSpec((Cout, Cin + 12), lambda n: (0, 0)),
                pl.BlockSpec((4, Cout, P), lambda n: (0, 0, 0)),
            ],
            out_specs=pl.BlockSpec((nb, Cout, P), lambda n: (n, 0, 0)),
        ),
        compiler_params=pltpu.CompilerParams(
            dimension_semantics=("parallel",)),
    )(x, p_slab, masks)

    # Free reshape (splits trailing dim) back to NCHW.
    return out.reshape(N, Cout, H, W)


def conv_dp_unit_ref(x_nchw, params, with_bn_relu=True):
    """Pure-JAX reference matching the PyTorch forward (eval-mode BN)."""
    eps = 1e-5
    Cout = params["conv1_w"].shape[0]
    dn = ("NCHW", "OIHW", "NCHW")
    y = lax.conv_general_dilated(x_nchw, params["conv1_w"], (1, 1), "VALID",
                                 dimension_numbers=dn)
    y = y + params["conv1_b"][None, :, None, None]
    y = lax.conv_general_dilated(y, params["conv2_w"], (1, 1),
                                 ((1, 1), (1, 1)), dimension_numbers=dn,
                                 feature_group_count=Cout)
    y = y + params["conv2_b"][None, :, None, None]
    if with_bn_relu:
        y = (y - params["bn_mean"][None, :, None, None]) / jnp.sqrt(
            params["bn_var"] + eps)[None, :, None, None]
        y = y * params["bn_gamma"][None, :, None, None] + \
            params["bn_beta"][None, :, None, None]
        y = jnp.maximum(y, 0.0)
    return y


def make_params(in_channels, out_channels, key):
    """Deterministic synthetic parameters with the module's shapes."""
    ks = jax.random.split(key, 8)
    return {
        "conv1_w": 0.1 * jax.random.normal(ks[0], (out_channels, in_channels, 1, 1), jnp.float32),
        "conv1_b": 0.1 * jax.random.normal(ks[1], (out_channels,), jnp.float32),
        "conv2_w": 0.1 * jax.random.normal(ks[2], (out_channels, 1, 3, 3), jnp.float32),
        "conv2_b": 0.1 * jax.random.normal(ks[3], (out_channels,), jnp.float32),
        "bn_gamma": 1.0 + 0.1 * jax.random.normal(ks[4], (out_channels,), jnp.float32),
        "bn_beta": 0.1 * jax.random.normal(ks[5], (out_channels,), jnp.float32),
        "bn_mean": 0.1 * jax.random.normal(ks[6], (out_channels,), jnp.float32),
        "bn_var": 0.5 + 0.1 * jnp.abs(jax.random.normal(ks[7], (out_channels,), jnp.float32)),
    }


if __name__ == "__main__":
    root = jax.random.PRNGKey(0)
    kx, kp = jax.random.split(root)

    # module-consistent small shapes: batch=2, Cin=4, 16x16 spatial, Cout=8
    N, Cin, H, W = 2, 4, 16, 16
    Cout = 8
    params = make_params(Cin, Cout, kp)
    x = jax.random.normal(kx, (N, Cin, H, W), jnp.float32)

    # with BN + ReLU (the default module configuration)
    out = jax.block_until_ready(conv_dp_unit(x, params, with_bn_relu=True))
    ref = conv_dp_unit_ref(x, params, with_bn_relu=True)
    assert out.shape == (N, Cout, H, W), out.shape
    assert jnp.allclose(out, ref, atol=5e-4, rtol=5e-4), \
        float(jnp.max(jnp.abs(out - ref)))

    # without BN/ReLU
    out2 = jax.block_until_ready(conv_dp_unit(x, params, with_bn_relu=False))
    ref2 = conv_dp_unit_ref(x, params, with_bn_relu=False)
    assert jnp.allclose(out2, ref2, atol=5e-4, rtol=5e-4), \
        float(jnp.max(jnp.abs(out2 - ref2)))

    # larger batch exercises the multi-image-per-grid-step path (Nb > 1)
    x3 = jax.random.normal(jax.random.PRNGKey(1), (8, Cin, H, W), jnp.float32)
    out3 = jax.block_until_ready(conv_dp_unit(x3, params, with_bn_relu=True))
    ref3 = conv_dp_unit_ref(x3, params, with_bn_relu=True)
    assert jnp.allclose(out3, ref3, atol=5e-4, rtol=5e-4), \
        float(jnp.max(jnp.abs(out3 - ref3)))

    print("KERNEL_OK")
</pallas_src>

<mosaic_0001>
module attributes {stable_mosaic.version = 11 : i64} {
  func.func @convdp_kernel(%arg0: i32, %arg1: memref<1x4x256xf32, #tpu.memory_space<vmem>>, %arg2: memref<8x16xf32, #tpu.memory_space<vmem>>, %arg3: memref<4x8x256xf32, #tpu.memory_space<vmem>>, %arg4: memref<1x8x256xf32, #tpu.memory_space<vmem>>) attributes {dimension_semantics = [#tpu.dimension_semantics<parallel>], iteration_bounds = array<i64: 2>, scalar_prefetch = 0 : i64, scratch_operands = 0 : i64, tpu.core_type = #tpu.core_type<tc>, window_params = [{transform_indices = @transform_0, window_bounds = array<i64: 1, 4, 256>}, {pipeline_mode = #tpu.pipeline_mode<synchronous>, transform_indices = @transform_1, window_bounds = array<i64: 8, 16>}, {pipeline_mode = #tpu.pipeline_mode<synchronous>, transform_indices = @transform_2, window_bounds = array<i64: 4, 8, 256>}, {transform_indices = @transform_3, window_bounds = array<i64: 1, 8, 256>}]} {
    %c0 = arith.constant 0 : index
    %c0_0 = arith.constant 0 : index
    %c0_1 = arith.constant 0 : index
    %0 = vector.load %arg1[%c0, %c0_0, %c0_1] : memref<1x4x256xf32, #tpu.memory_space<vmem>>, vector<1x4x256xf32>
    %c0_2 = arith.constant 0 : index
    %c0_3 = arith.constant 0 : index
    %1 = vector.load %arg2[%c0_2, %c0_3] : memref<8x16xf32, #tpu.memory_space<vmem>>, vector<8x16xf32>
    %2 = vector.extract_strided_slice %1 {offsets = [0, 0], sizes = [8, 4], strides = [1, 1]} : vector<8x16xf32> to vector<8x4xf32>
    %3 = vector.extract_strided_slice %1 {offsets = [0, 4], sizes = [8, 1], strides = [1, 1]} : vector<8x16xf32> to vector<8x1xf32>
    %4 = vector.extract_strided_slice %1 {offsets = [0, 5], sizes = [8, 9], strides = [1, 1]} : vector<8x16xf32> to vector<8x9xf32>
    %5 = vector.extract_strided_slice %1 {offsets = [0, 14], sizes = [8, 1], strides = [1, 1]} : vector<8x16xf32> to vector<8x1xf32>
    %6 = vector.extract_strided_slice %1 {offsets = [0, 15], sizes = [8, 1], strides = [1, 1]} : vector<8x16xf32> to vector<8x1xf32>
    %c0_4 = arith.constant 0 : index
    %c0_5 = arith.constant 0 : index
    %c0_6 = arith.constant 0 : index
    %7 = vector.load %arg3[%c0_4, %c0_5, %c0_6] : memref<4x8x256xf32, #tpu.memory_space<vmem>>, vector<1x8x256xf32>
    %8 = vector.shape_cast %7 : vector<1x8x256xf32> to vector<8x256xf32>
    %c1 = arith.constant 1 : index
    %c0_7 = arith.constant 0 : index
    %c0_8 = arith.constant 0 : index
    %9 = vector.load %arg3[%c1, %c0_7, %c0_8] : memref<4x8x256xf32, #tpu.memory_space<vmem>>, vector<1x8x256xf32>
    %10 = vector.shape_cast %9 : vector<1x8x256xf32> to vector<8x256xf32>
    %c2 = arith.constant 2 : index
    %c0_9 = arith.constant 0 : index
    %c0_10 = arith.constant 0 : index
    %11 = vector.load %arg3[%c2, %c0_9, %c0_10] : memref<4x8x256xf32, #tpu.memory_space<vmem>>, vector<1x8x256xf32>
    %12 = vector.shape_cast %11 : vector<1x8x256xf32> to vector<8x256xf32>
    %c3 = arith.constant 3 : index
    %c0_11 = arith.constant 0 : index
    %c0_12 = arith.constant 0 : index
    %13 = vector.load %arg3[%c3, %c0_11, %c0_12] : memref<4x8x256xf32, #tpu.memory_space<vmem>>, vector<1x8x256xf32>
    %14 = vector.shape_cast %13 : vector<1x8x256xf32> to vector<8x256xf32>
    %15 = vector.extract_strided_slice %2 {offsets = [0, 0], sizes = [8, 1], strides = [1, 1]} : vector<8x4xf32> to vector<8x1xf32>
    %16 = vector.extract_strided_slice %0 {offsets = [0, 0, 0], sizes = [1, 1, 256], strides = [1, 1, 1]} : vector<1x4x256xf32> to vector<1x1x256xf32>
    %17 = vector.shape_cast %15 : vector<8x1xf32> to vector<1x8x1xf32>
    %18 = vector.broadcast %17 : vector<1x8x1xf32> to vector<1x8x256xf32>
    %19 = vector.broadcast %16 : vector<1x1x256xf32> to vector<1x8x256xf32>
    %20 = arith.mulf %18, %19 : vector<1x8x256xf32>
    %21 = vector.extract_strided_slice %2 {offsets = [0, 1], sizes = [8, 1], strides = [1, 1]} : vector<8x4xf32> to vector<8x1xf32>
    %22 = vector.extract_strided_slice %0 {offsets = [0, 1, 0], sizes = [1, 1, 256], strides = [1, 1, 1]} : vector<1x4x256xf32> to vector<1x1x256xf32>
    %23 = vector.shape_cast %21 : vector<8x1xf32> to vector<1x8x1xf32>
    %24 = vector.broadcast %23 : vector<1x8x1xf32> to vector<1x8x256xf32>
    %25 = vector.broadcast %22 : vector<1x1x256xf32> to vector<1x8x256xf32>
    %26 = arith.mulf %24, %25 : vector<1x8x256xf32>
    %27 = vector.extract_strided_slice %2 {offsets = [0, 2], sizes = [8, 1], strides = [1, 1]} : vector<8x4xf32> to vector<8x1xf32>
    %28 = vector.extract_strided_slice %0 {offsets = [0, 2, 0], sizes = [1, 1, 256], strides = [1, 1, 1]} : vector<1x4x256xf32> to vector<1x1x256xf32>
    %29 = vector.shape_cast %27 : vector<8x1xf32> to vector<1x8x1xf32>
    %30 = vector.broadcast %29 : vector<1x8x1xf32> to vector<1x8x256xf32>
    %31 = vector.broadcast %28 : vector<1x1x256xf32> to vector<1x8x256xf32>
    %32 = arith.mulf %30, %31 : vector<1x8x256xf32>
    %33 = vector.extract_strided_slice %2 {offsets = [0, 3], sizes = [8, 1], strides = [1, 1]} : vector<8x4xf32> to vector<8x1xf32>
    %34 = vector.extract_strided_slice %0 {offsets = [0, 3, 0], sizes = [1, 1, 256], strides = [1, 1, 1]} : vector<1x4x256xf32> to vector<1x1x256xf32>
    %35 = vector.shape_cast %33 : vector<8x1xf32> to vector<1x8x1xf32>
    %36 = vector.broadcast %35 : vector<1x8x1xf32> to vector<1x8x256xf32>
    %37 = vector.broadcast %34 : vector<1x1x256xf32> to vector<1x8x256xf32>
    %38 = arith.mulf %36, %37 : vector<1x8x256xf32>
    %39 = arith.addf %20, %26 : vector<1x8x256xf32>
    %40 = arith.addf %32, %38 : vector<1x8x256xf32>
    %41 = arith.addf %39, %40 : vector<1x8x256xf32>
    %42 = vector.shape_cast %3 : vector<8x1xf32> to vector<1x8x1xf32>
    %43 = vector.broadcast %42 : vector<1x8x1xf32> to vector<1x8x256xf32>
    %44 = arith.addf %41, %43 : vector<1x8x256xf32>
    %c1_i32 = arith.constant 1 : i32
    %45 = tpu.dynamic_rotate %44 by %c1_i32 dim 2 : vector<1x8x256xf32>, i32 -> vector<1x8x256xf32>
    %46 = vector.shape_cast %8 : vector<8x256xf32> to vector<1x8x256xf32>
    %47 = arith.mulf %46, %45 : vector<1x8x256xf32>
    %c255_i32 = arith.constant 255 : i32
    %48 = tpu.dynamic_rotate %44 by %c255_i32 dim 2 : vector<1x8x256xf32>, i32 -> vector<1x8x256xf32>
    %49 = vector.shape_cast %10 : vector<8x256xf32> to vector<1x8x256xf32>
    %50 = arith.mulf %49, %48 : vector<1x8x256xf32>
    %51 = vector.extract_strided_slice %4 {offsets = [0, 0], sizes = [8, 1], strides = [1, 1]} : vector<8x9xf32> to vector<8x1xf32>
    %52 = vector.shape_cast %51 : vector<8x1xf32> to vector<1x8x1xf32>
    %53 = vector.broadcast %52 : vector<1x8x1xf32> to vector<1x8x256xf32>
    %54 = arith.mulf %53, %47 : vector<1x8x256xf32>
    %55 = vector.extract_strided_slice %4 {offsets = [0, 1], sizes = [8, 1], strides = [1, 1]} : vector<8x9xf32> to vector<8x1xf32>
    %56 = vector.shape_cast %55 : vector<8x1xf32> to vector<1x8x1xf32>
    %57 = vector.broadcast %56 : vector<1x8x1xf32> to vector<1x8x256xf32>
    %58 = arith.mulf %57, %44 : vector<1x8x256xf32>
    %59 = vector.extract_strided_slice %4 {offsets = [0, 2], sizes = [8, 1], strides = [1, 1]} : vector<8x9xf32> to vector<8x1xf32>
    %60 = vector.shape_cast %59 : vector<8x1xf32> to vector<1x8x1xf32>
    %61 = vector.broadcast %60 : vector<1x8x1xf32> to vector<1x8x256xf32>
    %62 = arith.mulf %61, %50 : vector<1x8x256xf32>
    %63 = arith.addf %54, %58 : vector<1x8x256xf32>
    %64 = arith.addf %63, %62 : vector<1x8x256xf32>
    %65 = vector.extract_strided_slice %4 {offsets = [0, 3], sizes = [8, 1], strides = [1, 1]} : vector<8x9xf32> to vector<8x1xf32>
    %66 = vector.shape_cast %65 : vector<8x1xf32> to vector<1x8x1xf32>
    %67 = vector.broadcast %66 : vector<1x8x1xf32> to vector<1x8x256xf32>
    %68 = arith.mulf %67, %47 : vector<1x8x256xf32>
    %69 = vector.extract_strided_slice %4 {offsets = [0, 4], sizes = [8, 1], strides = [1, 1]} : vector<8x9xf32> to vector<8x1xf32>
    %70 = vector.shape_cast %69 : vector<8x1xf32> to vector<1x8x1xf32>
    %71 = vector.broadcast %70 : vector<1x8x1xf32> to vector<1x8x256xf32>
    %72 = arith.mulf %71, %44 : vector<1x8x256xf32>
    %73 = vector.extract_strided_slice %4 {offsets = [0, 5], sizes = [8, 1], strides = [1, 1]} : vector<8x9xf32> to vector<8x1xf32>
    %74 = vector.shape_cast %73 : vector<8x1xf32> to vector<1x8x1xf32>
    %75 = vector.broadcast %74 : vector<1x8x1xf32> to vector<1x8x256xf32>
    %76 = arith.mulf %75, %50 : vector<1x8x256xf32>
    %77 = arith.addf %68, %72 : vector<1x8x256xf32>
    %78 = arith.addf %77, %76 : vector<1x8x256xf32>
    %79 = vector.extract_strided_slice %4 {offsets = [0, 6], sizes = [8, 1], strides = [1, 1]} : vector<8x9xf32> to vector<8x1xf32>
    %80 = vector.shape_cast %79 : vector<8x1xf32> to vector<1x8x1xf32>
    %81 = vector.broadcast %80 : vector<1x8x1xf32> to vector<1x8x256xf32>
    %82 = arith.mulf %81, %47 : vector<1x8x256xf32>
    %83 = vector.extract_strided_slice %4 {offsets = [0, 7], sizes = [8, 1], strides = [1, 1]} : vector<8x9xf32> to vector<8x1xf32>
    %84 = vector.shape_cast %83 : vector<8x1xf32> to vector<1x8x1xf32>
    %85 = vector.broadcast %84 : vector<1x8x1xf32> to vector<1x8x256xf32>
    %86 = arith.mulf %85, %44 : vector<1x8x256xf32>
    %87 = vector.extract_strided_slice %4 {offsets = [0, 8], sizes = [8, 1], strides = [1, 1]} : vector<8x9xf32> to vector<8x1xf32>
    %88 = vector.shape_cast %87 : vector<8x1xf32> to vector<1x8x1xf32>
    %89 = vector.broadcast %88 : vector<1x8x1xf32> to vector<1x8x256xf32>
    %90 = arith.mulf %89, %50 : vector<1x8x256xf32>
    %91 = arith.addf %82, %86 : vector<1x8x256xf32>
    %92 = arith.addf %91, %90 : vector<1x8x256xf32>
    %c16_i32 = arith.constant 16 : i32
    %93 = tpu.dynamic_rotate %64 by %c16_i32 dim 2 : vector<1x8x256xf32>, i32 -> vector<1x8x256xf32>
    %94 = vector.shape_cast %12 : vector<8x256xf32> to vector<1x8x256xf32>
    %95 = arith.mulf %94, %93 : vector<1x8x256xf32>
    %c240_i32 = arith.constant 240 : i32
    %96 = tpu.dynamic_rotate %92 by %c240_i32 dim 2 : vector<1x8x256xf32>, i32 -> vector<1x8x256xf32>
    %97 = vector.shape_cast %14 : vector<8x256xf32> to vector<1x8x256xf32>
    %98 = arith.mulf %97, %96 : vector<1x8x256xf32>
    %99 = arith.addf %95, %78 : vector<1x8x256xf32>
    %100 = arith.addf %99, %98 : vector<1x8x256xf32>
    %101 = vector.shape_cast %5 : vector<8x1xf32> to vector<1x8x1xf32>
    %102 = vector.broadcast %101 : vector<1x8x1xf32> to vector<1x8x256xf32>
    %103 = arith.mulf %100, %102 : vector<1x8x256xf32>
    %104 = vector.shape_cast %6 : vector<8x1xf32> to vector<1x8x1xf32>
    %105 = vector.broadcast %104 : vector<1x8x1xf32> to vector<1x8x256xf32>
    %106 = arith.addf %103, %105 : vector<1x8x256xf32>
    %cst = arith.constant 0.000000e+00 : f32
    %107 = vector.broadcast %cst : f32 to vector<1x8x256xf32>
    %108 = arith.maximumf %106, %107 : vector<1x8x256xf32>
    %c0_13 = arith.constant 0 : index
    %c0_14 = arith.constant 0 : index
    %c0_15 = arith.constant 0 : index
    %109 = vector.load %arg4[%c0_13, %c0_14, %c0_15] : memref<1x8x256xf32, #tpu.memory_space<vmem>>, vector<1x8x256xf32>
    tpu.vector_store %arg4[%c0_13, %c0_14, %c0_15], %108 {strides = array<i32>} : memref<1x8x256xf32, #tpu.memory_space<vmem>>, vector<1x8x256xf32>,
    return
  }
  func.func @transform_0(%arg0: i32) -> (i32, i32, i32) {
    %c0_i32 = arith.constant 0 : i32
    %c0_i32_0 = arith.constant 0 : i32
    %c0_i32_1 = arith.constant 0 : i32
    return %arg0, %c0_i32, %c0_i32_0 : i32, i32, i32
  }
  func.func @transform_1(%arg0: i32) -> (i32, i32) {
    %c0_i32 = arith.constant 0 : i32
    %c0_i32_0 = arith.constant 0 : i32
    %c0_i32_1 = arith.constant 0 : i32
    return %c0_i32, %c0_i32_0 : i32, i32
  }
  func.func @transform_2(%arg0: i32) -> (i32, i32, i32) {
    %c0_i32 = arith.constant 0 : i32
    %c0_i32_0 = arith.constant 0 : i32
    %c0_i32_1 = arith.constant 0 : i32
    %c0_i32_2 = arith.constant 0 : i32
    return %c0_i32, %c0_i32_0, %c0_i32_1 : i32, i32, i32
  }
  func.func @transform_3(%arg0: i32) -> (i32, i32, i32) {
    %c0_i32 = arith.constant 0 : i32
    %c0_i32_0 = arith.constant 0 : i32
    %c0_i32_1 = arith.constant 0 : i32
    return %arg0, %c0_i32, %c0_i32_0 : i32, i32, i32
  }
}

</mosaic_0001>

<bundles_post_ra>
// kernel: tpu_custom_call.1
= control target key start
LH: loop header
LB: loop body
LE: loop exit
PB: predicated region body
PF: predicated region fallthrough
CT: control target
= control target key end

     0   :  { %8 = vsyncpa [#allocation3], 0  ;;  %s1160_s0 = inlined_call_operand.hbm [shape: f32[2,4,256], index: 0, kind: input, shape index: {}]   ;;  %s1161_s1 = inlined_call_operand.hbm [shape: f32[8,16], index: 1, kind: input, shape index: {}]   ;;  %s1162_s2 = inlined_call_operand.hbm [shape: f32[4,8,256], index: 2, kind: input, shape index: {}]   ;;  %s1163_s3 = inlined_call_operand.hbm [shape: f32[2,8,256], index: 3, kind: output, shape index: {}]  }
   0x1   :  { %10 = vsyncpa [#allocation3 + $0x1], 0 }
   0x2   :  { %11 = vsyncpa [#allocation6], 0 }
   0x3   :  { %12 = vsyncpa [#allocation4], 0 }
   0x4   :  { %14 = vsyncpa [#allocation4 + $0x1], 0  ;;  %s894_s12 = smov 0   ;;  %s896_s13 = smov 0  }
   0x5   :  { %s898_s14 = smov 0   ;;  %s900_s15 = smov 0  }
   0x6 LB: > { %s915_s16 = sadd.s32 4294967295, %s846_s15   ;;  %s565_s17 = sadd.s32 4294967294, %s846_s15   ;;  %s846_s15 = sphi %s900_s15, %s1183_s15   ;;  %s842_s14 = sphi %s898_s14, %s1182_s14   ;;  %s838_s13 = sphi %s896_s13, %s1181_s13   ;;  %s834_s12 = sphi %s894_s12, %s1180_s12  }
   0x7   : > { %p40_p0 = scmp.ne.s32.totalorder %s838_s13, %s834_s12  ;;  %p1164_p1 = scmp.eq.s32.totalorder %s915_s16, 0 }
   0x8   : > { %p112_p3 = scmp.eq.s32.totalorder %s565_s17, 1  ;;  %p566_p5 = scmp.ge.s32.totalorder %s846_s15, 1 }
   0x9   : > { %p924_p4 = por %p1164_p1, %p40_p0  ;;  %p119_p7 = scmp.lt.s32.totalorder %s846_s15, 3 }
   0xa   : > { %p929_p6 = por %p112_p3, %p40_p0  ;;  %s848_s21 = smov [#allocation5]  }
   0xb   : > { %s1167_s18 = scalar_select %p924_p4, 1, 0 }
   0xc   : > { %s1168_s19 = scalar_select %p929_p6, 1, 0 }
   0xd   : > { %p934_p8 = pnand %p566_p5, %p119_p7  ;;  %s132_s22 = sshll.u32 %s848_s21, 4  ;;  %s133_s22 = int_to_ptr.vmem [resolvable:$true] %s132_s22 }
   0xe   : > { %s849_s23 = smov [#allocation7]   ;;  %s690_s28 = scalar_lea.hbm %s1161_s1, 128 }
   0xf   : > { %s1169_s20 = scalar_select %p934_p8, 1, 0 }
  0x10   : > { %p597_p10 = pneg %p934_p8  ;;  %s142_s24 = sshll.u32 %s849_s23, 4  ;;  %s947_s24 = int_to_ptr.vmem [resolvable:$true] %s142_s24 }
  0x11   : > { %p691_p12 = scmp.ne.s32.totalorder %s1161_s1, %s690_s28  ;;  %p697_p5 = scmp.lt.u32.totalorder %s690_s28, %s1161_s1 }
  0x12   : > { %p943_p11 = pnand %p597_p10, %p1164_p1 }
  0x14   : > { %p692_p13 = pneg %p943_p11 }
  0x16   : > { %p693_p0 = pnand %p692_p13, %p691_p12 }
  0x18   : > { %p694_p3 = pneg %p693_p0 }
  0x1a   : > { %p699_p7 = pnand %p697_p5, %p694_p3 }
  0x1c   : > { %702 = shalt.err (!%p699_p7)
}
  0x1d   : > { %s703_s6 = scalar_lea.vmem %s133_s22, 128  ;;  %p711_p2 = scmp.lt.s32.totalorder %s133_s22, %s133_s22 }
  0x1e   : > { %p704_p10 = scmp.ne.s32.totalorder %s133_s22, %s703_s6  ;;  %p712_p6 = scmp.lt.s32.totalorder %s703_s6, %s703_s6 }
  0x20   : > { %p706_p9 = pnand %p704_p10, %p692_p13  ;;  %p713_p4 = por %p712_p6, %p711_p2 }
  0x22   : > { %p707_p1 = pneg %p706_p9 }
  0x24   : > { %p714_p8 = pnand %p713_p4, %p707_p1 }
  0x26   : > { %717 = shalt.err (!%p714_p8)
}
  0x27   : > { %600 = dma.hbm_to_vmem [thread:$0]  (!%p943_p11), %s1161_s1, 128, %s133_s22, [#allocation6]  }
  0x28   : > { %s718_s11 = scalar_lea.hbm %s1162_s2, 1024 }
  0x29   : > { %p719_p9 = scmp.ne.s32.totalorder %s1162_s2, %s718_s11  ;;  %p725_p4 = scmp.lt.u32.totalorder %s718_s11, %s1162_s2 }
  0x2b   : > { %p721_p2 = pnand %p719_p9, %p692_p13 }
  0x2d   : > { %p722_p1 = pneg %p721_p2 }
  0x2f   : > { %p727_p6 = pnand %p725_p4, %p722_p1 }
  0x31   : > { %730 = shalt.err (!%p727_p6)
}
  0x32   : > { %s731_s22 = scalar_lea.vmem %s947_s24, 1024  ;;  %p739_p3 = scmp.lt.s32.totalorder %s947_s24, %s947_s24 }
  0x33   : > { %p732_p8 = scmp.ne.s32.totalorder %s947_s24, %s731_s22  ;;  %p740_p5 = scmp.lt.s32.totalorder %s731_s22, %s731_s22 }
  0x35   : > { %p734_p12 = pnand %p732_p8, %p692_p13  ;;  %p741_p7 = por %p740_p5, %p739_p3 }
  0x37   : > { %p735_p0 = pneg %p734_p12 }
  0x39   : > { %p742_p10 = pnand %p741_p7, %p735_p0 }
  0x3b   : > { %745 = shalt.err (!%p742_p10)
}
  0x3c   : > { %s850_s27 = smov 256   ;;  %s851_s28 = smov 16  }
  0x3d   : > { %603 = dma.hbm_to_vmem [thread:$0]  (!%p943_p11), %s1162_s2, 1024, %s947_s24, [#allocation6], %s850_s27, %s850_s27, %s851_s28  }
  0x3e   : > { %s997_s4 = sadd.s32 1, %s846_s15   ;;  %s27_s5 = sadd.s32 1, %s842_s14 }
  0x3f   : > { %s24_s6 = ssub.s32 %s846_s15, %s997_s4  ;;  %p34_p13 = scmp.ne.s32.totalorder %s842_s14, %s838_s13 }
  0x40   : > { %p25_p9 = scmp.eq.s32.totalorder %s24_s6, 0  ;;  %p35_p2 = scmp.eq.s32.totalorder %s846_s15, 0 }
  0x41   : > { %p1171_p1 = scmp.eq.s32.totalorder %s915_s16, 1  ;;  %p614_p6 = scmp.lt.s32.totalorder %s846_s15, 2 }
  0x42   : > { %s1013_s8 = scalar_select %p25_p9, %s842_s14, %s27_s5  }
  0x43   : > { %p1007_p4 = por %p1171_p1, %p34_p13  ;;  %p36_p8 = por %p35_p2, %p34_p13 }
  0x44   : > { %s156_s25 = sand.u32 1, %s842_s14   ;;  %s583_s24 = sshll.u32 %s846_s15, 7 }
  0x45   : > { %s570_s9 = sshll.u32 %s156_s25, 3  ;;  %s1020_s17 = scalar_lea.hbm %s1160_s0, %s583_s24 }
  0x46   : > { %s160_s21 = scalar_lea.vmem [#allocation2], %s570_s9  ;;  %p1024_p11 = pnand %p614_p6, %p36_p8 }
  0x47   : > { %s168_s23 = sshll.u32 %s160_s21, 4  ;;  %s157_s22 = scalar_lea.sflag [#allocation3], %s156_s25  ;;  %s1022_s23 = int_to_ptr.vmem [resolvable:$true] %s168_s23 }
  0x48   : > { %s746_s27 = scalar_lea.hbm %s1020_s17, 128  ;;  %p748_p0 = pneg %p1024_p11 }
  0x49   : > { %p747_p12 = scmp.ne.s32.totalorder %s1020_s17, %s746_s27  ;;  %s751_s30 = scalar_lea.hbm %s1160_s0, 256 }
  0x4a   : > { %p752_p7 = scmp.lt.u32.totalorder %s1020_s17, %s1160_s0  ;;  %p753_p10 = scmp.lt.u32.totalorder %s751_s30, %s746_s27 }
  0x4b   : > { %p749_p3 = pnand %p748_p0, %p747_p12  ;;  %p755_p9 = scmp.lt.u32.totalorder %s746_s27, %s1020_s17 }
  0x4c   : > { %p754_p13 = por %p753_p10, %p752_p7 }
  0x4d   : > { %p750_p5 = pneg %p749_p3 }
  0x4e   : > { %p756_p2 = por %p755_p9, %p754_p13 }
  0x50   : > { %p757_p1 = pnand %p756_p2, %p750_p5 }
  0x52   : > { %760 = shalt.err (!%p757_p1)
}
  0x53   : > { %s761_s25 = scalar_lea.vmem %s1022_s23, 128  ;;  %s852_s9 = smov [#allocation2]  }
  0x54   : > { %p762_p6 = scmp.ne.s32.totalorder %s1022_s23, %s761_s25  ;;  %s766_s24 = sshll.u32 %s852_s9, 4  ;;  %s767_s24 = int_to_ptr.vmem [resolvable:$false] %s766_s24 }
  0x55   : > { %s768_s10 = scalar_lea.vmem %s767_s24, 256  ;;  %p769_p3 = scmp.lt.s32.totalorder %s1022_s23, %s767_s24 }
  0x56   : > { %p764_p8 = pnand %p762_p6, %p748_p0  ;;  %p770_p7 = scmp.lt.s32.totalorder %s768_s10, %s761_s25 }
  0x58   : > { %p765_p12 = pneg %p764_p8  ;;  %p771_p10 = por %p770_p7, %p769_p3 }
  0x5a   : > { %p772_p13 = pnand %p771_p10, %p765_p12 }
  0x5c   : > { %775 = shalt.err (!%p772_p13)
}
  0x5d   : > { %607 = dma.hbm_to_vmem [thread:$0]  (!%p1024_p11), %s1020_s17, 128, %s1022_s23, %s157_s22  }
  0x5e   : > { %p1174_p5 = scmp.ne.s32.totalorder %s1169_s20, 0 }
  0x5f   : > { %s1056_s11 = sand.u32 (!%p1174_p5), 1, %s838_s13   ;;  %p1175_p0 = scmp.ne.s32.totalorder (!%p1174_p5), %s1167_s18, 0 }
  0x60   : > { %177 = sbr.rel (%p1174_p5) target bundleno = 526 (0x20e), region = 32  ;;  %s574_s21 = sshll.u32 (!%p1174_p5), %s1056_s11, 3 }
  0x61   : > { %s180_s27 = scalar_lea.sflag (!%p1174_p5), [#allocation3], %s1056_s11  ;;  %s1060_s28 = scalar_lea.vmem (!%p1174_p5), [#allocation2], %s574_s21 }
  0x67   : > { %821 = dma.done.wait (%p1175_p0), %s180_s27, 128  }
  0x68   : > { %823 = vsyncadd (%p1175_p0), %s180_s27, 4294967168  ;;  %p1176_p11 = scmp.eq.s32.totalorder %s915_s16, 0 }
  0x6a   : > { %825 = dma.done.wait (%p1176_p11), [#allocation6], 1152   ;;  %p1177_p9 = pmov %p1176_p11 }
  0x6b   : > { %v853_v0 = vmov 2   ;;  %v854_v1 = vmov 0   ;;  %v1070_v2 = vld [vmem:[#allocation5] sm:$0xff]  ;;  %v855_v3 = vmov 3   ;;  %v856_v4 = vmov 1   ;;  %v214_v20 = vld [vmem:[%s1060_s28] sm:$0xff] }
  0x6c   : > { %827 = vsyncadd (%p1177_p9), [#allocation6], 4294966144  ;;  %676 = vset.pattern.permute.xlu1 %v853_v0  ;;  %674 = vset.pattern.permute.xlu0 %v854_v1  ;;  %v857_v5 = vmov 4   ;;  %v858_v6 = vmov 5   ;;  %v859_v7 = vmov 6   ;;  %v860_v8 = vmov 11  }
  0x6d   : > { %278 = vperm.xlu1 %676, %v1070_v2   ;;  %229 = vperm.xlu0 %674, %v1070_v2   ;;  %v861_v9 = vmov 7   ;;  %v862_v10 = vmov 8   ;;  %v863_v11 = vmov 12   ;;  %v864_v12 = vmov 13   ;;  %s866_s18 = smov 1   ;;  %s867_s20 = smov 127  }
  0x6e   : > { %v865_v13 = vmov 9   ;;  %v233_v14 = vlaneseq  ;;  %v868_v62 = vmov 10   ;;  %v869_v63 = vmov 14   ;;  %s871_s17 = smov 16   ;;  %s872_s23 = smov 112  }
  0x6f   : > { %v870_v0 = vmov 15   ;;  %s577_s26 = sshll.u32 %s1056_s11, 4  ;;  %s584_s22 = sshll.u32 %s915_s16, 8 }
  0x70   : > { %v234_v15 = vshrl.u32 %v233_v14, 7  ;;  %s213_s29 = scalar_lea.vmem [#allocation8], %s577_s26  ;;  %s1116_s25 = scalar_lea.hbm %s1163_s3, %s584_s22 }
  0x71   : > { %677 = vset.pattern.permute.xlu1 %v855_v3  ;;  %675 = vset.pattern.permute.xlu0 %v856_v4  ;;  %s476_s30 = sshll.u32 %s213_s29, 4  ;;  %s462_s9 = scalar_lea.sflag [#allocation4], %s1056_s11  ;;  %s1118_s30 = int_to_ptr.vmem [resolvable:$true] %s476_s30 }
  0x72   : > { %302 = vperm.xlu1 %677, %v1070_v2   ;;  %254 = vperm.xlu0 %675, %v1070_v2   ;;  %v283_v16 = vsub.s32 2, %v234_v15  ;;  %v287_v17 = vsub.s32 6, %v234_v15  ;;  %v235_v18 = vsub.s32 0, %v234_v15  ;;  %v239_v19 = vsub.s32 4, %v234_v15  ;;  %s776_s16 = scalar_lea.vmem %s1118_s30, 256  ;;  %s873_s24 = smov [#allocation8]  }
  0x73   : > { %v307_v21 = vsub.s32 3, %v234_v15  ;;  %v311_v22 = vsub.s32 7, %v234_v15  ;;  %v259_v23 = vsub.s32 1, %v234_v15  ;;  %v263_v24 = vsub.s32 5, %v234_v15  ;;  %p777_p2 = scmp.ne.s32.totalorder %s1118_s30, %s776_s16  ;;  %s780_s10 = sshll.u32 %s873_s24, 4  ;;  %s781_s10 = int_to_ptr.vmem [resolvable:$false] %s780_s10 }
  0x74   : > { %v284_v25 = vrot.slane %v214_v20, %v283_v16  ;;  %v288_v26 = vrot.slane %v214_v20, %v287_v17  ;;  %v236_v27 = vrot.slane %v214_v20, %v235_v18  ;;  %v240_v28 = vrot.slane %v214_v20, %v239_v19  ;;  %v220_v19 = vld [vmem:[#allocation7 + $0x18] sm:$0xff]  ;;  %s782_s21 = scalar_lea.vmem %s781_s10, 512  ;;  %p783_p8 = scmp.lt.s32.totalorder %s1118_s30, %s781_s10 }
  0x75   : > { %v308_v29 = vrot.slane %v214_v20, %v307_v21  ;;  %v312_v30 = vrot.slane %v214_v20, %v311_v22  ;;  %v260_v31 = vrot.slane %v214_v20, %v259_v23  ;;  %v264_v32 = vrot.slane %v214_v20, %v263_v24  ;;  %p778_p1 = pnand %p777_p2, %p1007_p4  ;;  %p784_p12 = scmp.lt.s32.totalorder %s782_s21, %s776_s16 }
  0x76   : > { %678 = vset.pattern.permute.xlu1 %v857_v5  ;;  %679 = vset.pattern.permute.xlu0 %v858_v6  ;;  %v294_v35 = vrot.slane %v284_v25, %v283_v16  ;;  %v298_v36 = vrot.slane %v288_v26, %v283_v16  ;;  %v246_v37 = vrot.slane %v236_v27, %v235_v18 }
  0x77   : > { %332 = vperm.xlu1 %678, %v1070_v2   ;;  %358 = vperm.xlu0 %679, %v1070_v2   ;;  %v250_v38 = vrot.slane %v240_v28, %v235_v18  ;;  %v318_v39 = vrot.slane %v308_v29, %v307_v21  ;;  %v322_v40 = vrot.slane %v312_v30, %v307_v21  ;;  %v219_v18 = vld [vmem:[#allocation7 + $0x10] sm:$0xff]  ;;  %p779_p6 = pneg %p778_p1  ;;  %p785_p3 = por %p784_p12, %p783_p8 }
  0x78   : > { %v270_v41 = vrot.slane %v260_v31, %v259_v23  ;;  %v274_v42 = vrot.slane %v264_v32, %v259_v23 }
  0x79   : > { %p786_p7 = pnand %p785_p3, %p779_p6 }
  0x7b   : > { %680 = vset.pattern.permute.xlu1 %v859_v7  ;;  %682 = vset.pattern.permute.xlu0 %v860_v8  ;;  %v1098_v8 = vand.u32 127, %v233_v14 }
  0x7c   : > { %364 = vperm.xlu1 %680, %v1070_v2   ;;  %402 = vperm.xlu0 %682, %v1070_v2  }
  0x7d   : > { %vm343_vm0 = vcmp.lt.s32.totalorder %v1098_v8, 1  ;;  %vm352_vm1 = vcmp.lt.s32.totalorder %v1098_v8, 127  ;;  %vm427_vm2 = vcmp.lt.s32.totalorder %v1098_v8, 16  ;;  %vm436_vm3 = vcmp.lt.s32.totalorder %v1098_v8, 112 }
  0x80   : > { %681 = vset.pattern.permute.xlu1 %v861_v9  ;;  %685 = vset.pattern.permute.xlu0 %v862_v10  ;;  %v216_v9 = vld [vmem:[#allocation7] sm:$0xff]  ;;  %v217_v10 = vld [vmem:[#allocation7 + $0x8] sm:$0xff] }
  0x81   : > { %370 = vperm.xlu1 %681, %v1070_v2  }
  0x85   : > { %683 = vset.pattern.permute.xlu1 %v863_v11 }
  0x86   : > { %408 = vperm.xlu1 %683, %v1070_v2  }
  0x8a   : > { %684 = vset.pattern.permute.xlu1 %v864_v12 }
  0x8b   : > { %414 = vperm.xlu1 %684, %v1070_v2  }
  0x8f   : > { %686 = vset.pattern.permute.xlu1 %v865_v13 }
  0xec   : > { %v279_v33 = vpop.permute.xlu1 %278  ;;  %v230_v34 = vpop.permute.xlu0 %229 }
  0xed   : > { %v299_v43 = vmul.f32 %v294_v35, %v279_v33  ;;  %v300_v44 = vmul.f32 %v298_v36, %v279_v33  ;;  %v251_v45 = vmul.f32 %v246_v37, %v230_v34  ;;  %v252_v46 = vmul.f32 %v250_v38, %v230_v34 }
  0xf1   : > { %v303_v47 = vpop.permute.xlu1 %302  ;;  %v255_v48 = vpop.permute.xlu0 %254 }
  0xf2   : > { %v323_v49 = vmul.f32 %v318_v39, %v303_v47  ;;  %v324_v50 = vmul.f32 %v322_v40, %v303_v47  ;;  %v275_v51 = vmul.f32 %v270_v41, %v255_v48  ;;  %v276_v52 = vmul.f32 %v274_v42, %v255_v48 }
  0xf4   : > { %v327_v53 = vadd.f32 %v323_v49, %v299_v43  ;;  %v328_v54 = vadd.f32 %v324_v50, %v300_v44  ;;  %v325_v55 = vadd.f32 %v275_v51, %v251_v45  ;;  %v326_v56 = vadd.f32 %v276_v52, %v252_v46 }
  0xf6   : > { %v333_v57 = vpop.permute.xlu1 %332  ;;  %v329_v58 = vadd.f32 %v327_v53, %v325_v55  ;;  %v330_v59 = vadd.f32 %v328_v54, %v326_v56  ;;  %v359_v4 = vpop.permute.xlu0 %358 }
  0xf8   : > { %v1085_v60 = vadd.f32 %v333_v57, %v329_v58  ;;  %v1087_v61 = vadd.f32 %v333_v57, %v330_v59 }
  0xfa   : > { %339 = vrot.lane.b32.xlu0 %v1087_v61, %s866_s18  ;;  %337 = vrot.lane.b32.xlu1 %v1085_v60, %s866_s18 }
  0xfb   : > { %v365_v1 = vpop.permute.xlu1 %364  ;;  %v403_v7 = vpop.permute.xlu0 %402 }
  0xfc   : > { %v367_v25 = vmul.f32 %v365_v1, %v1085_v60  ;;  %v368_v26 = vmul.f32 %v365_v1, %v1087_v61 }
  0xfe   : > { %348 = vrot.lane.b32.xlu0 %v1085_v60, %s867_s20  ;;  %350 = vrot.lane.b32.xlu1 %v1087_v61, %s867_s20 }
 0x100   : > { %v371_v3 = vpop.permute.xlu1 %370 }
 0x102   : > { %380 = vperm.xlu0 %685, %v1070_v2   ;;  %386 = vperm.xlu1 %686, %v1070_v2  }
 0x105   : > { %v409_v5 = vpop.permute.xlu1 %408 }
 0x106   : > { %687 = vset.pattern.permute.xlu1 %v868_v62  ;;  %688 = vset.pattern.permute.xlu0 %v869_v63  ;;  %v411_v34 = vmul.f32 %v409_v5, %v1085_v60  ;;  %v412_v40 = vmul.f32 %v409_v5, %v1087_v61  ;;  %v222_v62 = vld [vmem:[#allocation7 + $0x20] sm:$0xff]  ;;  %v223_v63 = vld [vmem:[#allocation7 + $0x28] sm:$0xff]  ;;  %v226_v5 = vld [vmem:[#allocation7 + $0x38] sm:$0xff] }
 0x107   : > { %392 = vperm.xlu1 %687, %v1070_v2   ;;  %446 = vperm.xlu0 %688, %v1070_v2  }
 0x10a   : > { %v415_v6 = vpop.permute.xlu1 %414 }
 0x10b   : > { %689 = vset.pattern.permute.xlu0 %v870_v0 }
 0x16c   : > { %v340_v11 = vpop.permute.xlu0 %339  ;;  %v338_v12 = vpop.permute.xlu1 %337 }
 0x16d   : > { %v344_v13 = vsel %vm343_vm0, %v338_v12, %v340_v11  ;;  %v345_v15 = vsel %vm343_vm0, %v340_v11, %v338_v12 }
 0x16e   : > { %v346_v16 = vmul.f32 %v345_v15, %v216_v9  ;;  %v347_v17 = vmul.f32 %v344_v13, %v217_v10 }
 0x170   : > { %v361_v20 = vmul.f32 %v359_v4, %v346_v16  ;;  %v362_v21 = vmul.f32 %v359_v4, %v347_v17  ;;  %v349_v22 = vpop.permute.xlu0 %348  ;;  %v351_v23 = vpop.permute.xlu1 %350  ;;  %v405_v29 = vmul.f32 %v403_v7, %v346_v16  ;;  %v406_v38 = vmul.f32 %v403_v7, %v347_v17  ;;  %v225_v4 = vld [vmem:[#allocation7 + $0x30] sm:$0xff] }
 0x171   : > { %v353_v14 = vsel %vm352_vm1, %v349_v22, %v351_v23  ;;  %v354_v24 = vsel %vm352_vm1, %v351_v23, %v349_v22 }
 0x172   : > { %v355_v27 = vmul.f32 %v353_v14, %v219_v18  ;;  %v356_v28 = vmul.f32 %v354_v24, %v220_v19  ;;  %v376_v31 = vadd.f32 %v368_v26, %v362_v21  ;;  %v375_v33 = vadd.f32 %v367_v25, %v361_v20 }
 0x173   : > { %v419_v39 = vadd.f32 %v411_v34, %v405_v29  ;;  %v420_v43 = vadd.f32 %v412_v40, %v406_v38 }
 0x174   : > { %v374_v30 = vmul.f32 %v371_v3, %v356_v28  ;;  %v373_v32 = vmul.f32 %v371_v3, %v355_v27  ;;  %v417_v37 = vmul.f32 %v415_v6, %v355_v27  ;;  %v418_v42 = vmul.f32 %v415_v6, %v356_v28 }
 0x176   : > { %v378_v35 = vadd.f32 %v376_v31, %v374_v30  ;;  %v377_v36 = vadd.f32 %v375_v33, %v373_v32  ;;  %v421_v41 = vadd.f32 %v419_v39, %v417_v37  ;;  %v422_v44 = vadd.f32 %v420_v43, %v418_v42 }
 0x178   : > { %425 = vrot.lane.b32.xlu1 %v378_v35, %s871_s17  ;;  %423 = vrot.lane.b32.xlu0 %v377_v36, %s871_s17 }
 0x17c   : > { %432 = vrot.lane.b32.xlu1 %v421_v41, %s872_s23  ;;  %452 = vperm.xlu0 %689, %v1070_v2  }
 0x180   : > { %434 = vrot.lane.b32.xlu1 %v422_v44, %s872_s23 }
 0x181   : > { %v381_v45 = vpop.permute.xlu0 %380  ;;  %v387_v46 = vpop.permute.xlu1 %386 }
 0x182   : > { %v383_v47 = vmul.f32 %v381_v45, %v346_v16  ;;  %v384_v48 = vmul.f32 %v381_v45, %v347_v17  ;;  %v389_v49 = vmul.f32 %v387_v46, %v1085_v60  ;;  %v390_v50 = vmul.f32 %v387_v46, %v1087_v61 }
 0x184   : > { %v397_v52 = vadd.f32 %v389_v49, %v383_v47  ;;  %v398_v53 = vadd.f32 %v390_v50, %v384_v48 }
 0x186   : > { %v393_v51 = vpop.permute.xlu1 %392  ;;  %v447_v58 = vpop.permute.xlu0 %446 }
 0x187   : > { %v395_v54 = vmul.f32 %v393_v51, %v355_v27  ;;  %v396_v55 = vmul.f32 %v393_v51, %v356_v28 }
 0x189   : > { %v399_v56 = vadd.f32 %v397_v52, %v395_v54  ;;  %v400_v57 = vadd.f32 %v398_v53, %v396_v55 }
 0x1ea   : > { %v426_v2 = vpop.permute.xlu1 %425  ;;  %v424_v59 = vpop.permute.xlu0 %423 }
 0x1eb   : > { %v428_v0 = vsel %vm427_vm2, %v424_v59, %v426_v2  ;;  %v429_v1 = vsel %vm427_vm2, %v426_v2, %v424_v59 }
 0x1ec   : > { %v430_v3 = vmul.f32 %v429_v1, %v222_v62  ;;  %v431_v61 = vmul.f32 %v428_v0, %v223_v63 }
 0x1ee   : > { %v433_v60 = vpop.permute.xlu1 %432  ;;  %v441_v10 = vadd.f32 %v430_v3, %v399_v56  ;;  %v442_v11 = vadd.f32 %v431_v61, %v400_v57 }
 0x1f2   : > { %v435_v6 = vpop.permute.xlu1 %434 }
 0x1f3   : > { %v437_v7 = vsel %vm436_vm3, %v433_v60, %v435_v6  ;;  %v438_v9 = vsel %vm436_vm3, %v435_v6, %v433_v60 }
 0x1f4   : > { %v439_v12 = vmul.f32 %v437_v7, %v225_v4  ;;  %v440_v13 = vmul.f32 %v438_v9, %v226_v5 }
 0x1f6   : > { %v443_v15 = vadd.f32 %v441_v10, %v439_v12  ;;  %v444_v16 = vadd.f32 %v442_v11, %v440_v13 }
 0x1f8   : > { %v449_v17 = vmul.f32 %v447_v58, %v443_v15  ;;  %v450_v18 = vmul.f32 %v447_v58, %v444_v16 }
 0x1fb   : > { %v453_v19 = vpop.permute.xlu0 %452 }
 0x1fc   : > { %v455_v8 = vadd.f32 %v453_v19, %v449_v17  ;;  %v456_v20 = vadd.f32 %v453_v19, %v450_v18 }
 0x1fe   : > { %v457_v21 = vmax.f32 %v455_v8, 0.0  ;;  %v458_v22 = vmax.f32 %v456_v20, 0.0 }
 0x200   : > { %459 = vst [vmem:[%s213_s29] sm:$0xff] %v457_v21  ;;  %460 = vst [vmem:[%s213_s29 + $0x8] sm:$0xff] %v458_v22 }
 0x201   : > { %789 = shalt.err (!%p786_p7)
}
 0x202   : > { %s790_s11 = scalar_lea.hbm %s1116_s25, 256  ;;  %s794_s18 = scalar_lea.hbm %s1163_s3, 512 }
 0x203   : > { %p791_p10 = scmp.ne.s32.totalorder %s1116_s25, %s790_s11  ;;  %p795_p0 = scmp.lt.u32.totalorder %s1116_s25, %s1163_s3 }
 0x204   : > { %p796_p11 = scmp.lt.u32.totalorder %s794_s18, %s790_s11  ;;  %p798_p2 = scmp.lt.u32.totalorder %s790_s11, %s1116_s25 }
 0x205   : > { %p792_p13 = pnand %p791_p10, %p1007_p4 }
 0x206   : > { %p797_p9 = por %p796_p11, %p795_p0 }
 0x207   : > { %p793_p5 = pneg %p792_p13 }
 0x208   : > { %p799_p1 = por %p798_p2, %p797_p9 }
 0x20a   : > { %p800_p6 = pnand %p799_p1, %p793_p5 }
 0x20c   : > { %803 = shalt.err (!%p800_p6)
}
 0x20d   : > { %595 = dma.vmem_to_hbm [thread:$0]  (%p1007_p4), %s1118_s30, 256, %s1116_s25, %s462_s9  }
 0x20e PF: > { %s488_s23 = sand.u32 1, %s834_s12   ;;  %p1178_p8 = scmp.ne.s32.totalorder %s1168_s19, 0 }
 0x20f   : > { %p1179_p12 = scmp.ge.s32.totalorder %s846_s15, 2  ;;  %s489_s26 = scalar_lea.sflag [#allocation4], %s488_s23 }
 0x211   : > { %p609_p3 = pnand %p1179_p12, %p1178_p8 }
 0x213   : > { %829 = dma.done.wait (!%p609_p3), %s489_s26, 256  }
 0x214   : > { %831 = vsyncadd (!%p609_p3), %s489_s26, 4294967040  ;;  %p17_p7 = scmp.ge.s32.totalorder %s997_s4, 4   ;;  %s1180_s12 = smov %s838_s13 }
 0x215   : > { %s1181_s13 = smov %s842_s14  ;;  %s1182_s14 = smov %s1013_s8 }
 0x216   : > { %s1183_s15 = smov %s997_s4  ;;  %19 = sbr.rel (!%p17_p7) target bundleno = 6 (0x6), region = 88 }
 0x21d   :  { %494 = vsyncpa [#allocation3], 1 }
 0x21e   :  { %496 = vsyncpa [#allocation3 + $0x1], 1 }
 0x21f   :  { %497 = vsyncpa [#allocation6], 1 }
 0x220   :  { %498 = vsyncpa [#allocation4], 1 }
 0x221   :  { %500 = vsyncpa [#allocation4 + $0x1], 1 }

</bundles_post_ra>
